<compile_context>
chip_gen: v5e
topology: v5e:2x2
jax: 0.10.0
libtpu: 0.0.40
codegen_flags: <defaults>
</compile_context>

<pallas_src>
import functools

import jax
import jax.numpy as jnp
from jax.experimental import pallas as pl
from jax.experimental.pallas import tpu as pltpu


IN_FEATURES = 400  # fixed by the module: SineActivation(400, hidden_dim)


def _t2v_mlp_kernel(x_ref, w_ref, b_ref, wfc_t_ref, bfc_ref, out_ref, *, use_sin):
    # Time2Vec matmul: (TB, F)[f32] @ (F, H)[f32] -> (TB, H)[f32] on the MXU.
    t = jnp.dot(x_ref[...], w_ref[...], preferred_element_type=jnp.float32)
    t = t + b_ref[...]  # bias broadcast over the batch tile

    # Periodic activation on the first H-1 columns, identity on the last
    # (reproduces concat([f(x@w+b), x@w0+b0], dim=1)). EUP/VPU work that sits
    # under the x DMA — intentionally not "optimized".
    h_dim = t.shape[-1]
    col = jax.lax.broadcasted_iota(jnp.int32, t.shape, dimension=1)
    act = jnp.sin(t) if use_sin else jnp.cos(t)
    h = jnp.where(col < (h_dim - 1), act, t)

    # Head matmul, computed transposed for a lane-dense output:
    # (2, H) x (TB, H) contracting on H -> (2, TB)  (i.e. Wfc_t @ h^T).
    y_t = jax.lax.dot_general(
        wfc_t_ref[...], h,
        dimension_numbers=(((1,), (1,)), ((), ())),
        preferred_element_type=jnp.float32)
    out_ref[...] = y_t + bfc_ref[...]  # (2, 1) bias broadcast over lanes


def t2v_model_forward(x, w_packed, b_packed, w_fc, b_fc, *,
                      activation="sin", block_batch=4096):
    """x: (B, 400) f32. w_packed: (400, H). b_packed: (H,) or (1, H).
    w_fc: (H, 2). b_fc: (2,) or (1, 2). Returns (B, 2) f32."""
    B, F = x.shape
    H = w_packed.shape[1]

    # block_batch must be a multiple of 128 so the transposed (2, tb) output
    # block is lane-aligned when B > block_batch; for small batches use the
    # full batch as a single block (block dim == full array dim is allowed).
    assert block_batch % 128 == 0
    tb = B if B <= block_batch else block_batch
    grid = (pl.cdiv(B, tb),)  # ragged last block is masked by Pallas; no pad copy

    w_packed = w_packed.astype(jnp.float32)
    b_packed = jnp.reshape(b_packed, (1, H)).astype(jnp.float32)
    w_fc_t = jnp.transpose(jnp.asarray(w_fc, jnp.float32))       # (2, H), tiny
    b_fc_col = jnp.reshape(jnp.asarray(b_fc, jnp.float32), (2, 1))

    cost = pl.CostEstimate(
        flops=2 * B * F * H + 2 * B * H * 2,
        transcendentals=B * (H - 1),
        bytes_accessed=(x.size * 4 + w_packed.size * 4 + b_packed.size * 4
                        + w_fc_t.size * 4 + b_fc_col.size * 4 + B * 2 * 4),
    )

    kernel = functools.partial(_t2v_mlp_kernel, use_sin=(activation == "sin"))
    out_t = pl.pallas_call(
        kernel,
        out_shape=jax.ShapeDtypeStruct((2, B), jnp.float32),
        grid=grid,
        in_specs=[
            # x: streamed per batch tile (double-buffered HBM->VMEM by Pallas).
            pl.BlockSpec((tb, F), lambda i: (i, 0)),
            # Weights / biases: constant block index -> DMA'd once, resident.
            pl.BlockSpec((F, H), lambda i: (0, 0)),
            pl.BlockSpec((1, H), lambda i: (0, 0)),
            pl.BlockSpec((2, H), lambda i: (0, 0)),
            pl.BlockSpec((2, 1), lambda i: (0, 0)),
        ],
        # Lane-dense output: batch on the 128-lane axis.
        out_specs=pl.BlockSpec((2, tb), lambda i: (0, i)),
        compiler_params=pltpu.CompilerParams(
            dimension_semantics=("parallel",),
            vmem_limit_bytes=32 * 1024 * 1024,
        ),
        cost_estimate=cost,
    )(x, w_packed, b_packed, w_fc_t, b_fc_col)

    return out_t.T  # (B, 2); tiny transpose in the caller


def _reference(x, w_packed, b_packed, w_fc, b_fc, activation="sin"):
    # Pure f32 reference mirroring the PyTorch module's forward.
    t = jnp.dot(x, w_packed, precision=jax.lax.Precision.HIGHEST) + \
        jnp.reshape(b_packed, (1, -1))
    f = jnp.sin if activation == "sin" else jnp.cos
    h = jnp.concatenate([f(t[:, :-1]), t[:, -1:]], axis=1)
    return jnp.dot(h, w_fc, precision=jax.lax.Precision.HIGHEST) + \
        jnp.reshape(b_fc, (1, 2))


if __name__ == "__main__":
    HIDDEN = 32          # hiddem_dim
    BATCH = 8
    ACTIVATION = "sin"

    key = jax.random.PRNGKey(0)
    kx, kw, kw0, kb, kb0, kfw, kfb = jax.random.split(key, 7)

    # Inputs.
    x = jax.random.normal(kx, (BATCH, IN_FEATURES), dtype=jnp.float32)

    # Time2Vec params (torch.randn-style init, deterministic here).
    w = jax.random.normal(kw, (IN_FEATURES, HIDDEN - 1), dtype=jnp.float32)
    w0 = jax.random.normal(kw0, (IN_FEATURES, 1), dtype=jnp.float32)
    b = jax.random.normal(kb, (HIDDEN - 1,), dtype=jnp.float32)
    b0 = jax.random.normal(kb0, (1,), dtype=jnp.float32)

    # Pack w/w0 and b/b0 so the kernel does a single matmul. Last column = v2.
    w_packed = jnp.concatenate([w, w0], axis=1)            # (F, H)
    b_packed = jnp.concatenate([b, b0], axis=0)            # (H,)

    # fc1 = nn.Linear(HIDDEN, 2): uniform(-1/sqrt(H), 1/sqrt(H)) init.
    bound = 1.0 / (HIDDEN ** 0.5)
    w_fc = jax.random.uniform(kfw, (HIDDEN, 2), jnp.float32, -bound, bound)
    b_fc = jax.random.uniform(kfb, (2,), jnp.float32, -bound, bound)

    out = t2v_model_forward(x, w_packed, b_packed, w_fc, b_fc,
                            activation=ACTIVATION)
    out = jax.block_until_ready(out)

    ref = _reference(x, w_packed, b_packed, w_fc, b_fc, ACTIVATION)
    assert out.shape == (BATCH, 2)
    assert jnp.allclose(out, ref, atol=1e-2, rtol=1e-2), "mismatch vs reference"

    print("KERNEL_OK")
</pallas_src>

<mosaic_0001>
module attributes {stable_mosaic.version = 11 : i64} {
  func.func @_t2v_mlp_kernel(%arg0: i32, %arg1: memref<8x400xf32, #tpu.memory_space<vmem>>, %arg2: memref<400x32xf32, #tpu.memory_space<vmem>>, %arg3: memref<1x32xf32, #tpu.memory_space<vmem>>, %arg4: memref<2x32xf32, #tpu.memory_space<vmem>>, %arg5: memref<2x1xf32, #tpu.memory_space<vmem>>, %arg6: memref<2x8xf32, #tpu.memory_space<vmem>>) attributes {dimension_semantics = [#tpu.dimension_semantics<parallel>], iteration_bounds = array<i64: 1>, scalar_prefetch = 0 : i64, scratch_operands = 0 : i64, tpu.core_type = #tpu.core_type<tc>, window_params = [{transform_indices = @transform_0, window_bounds = array<i64: 8, 400>}, {pipeline_mode = #tpu.pipeline_mode<synchronous>, transform_indices = @transform_1, window_bounds = array<i64: 400, 32>}, {pipeline_mode = #tpu.pipeline_mode<synchronous>, transform_indices = @transform_2, window_bounds = array<i64: 1, 32>}, {pipeline_mode = #tpu.pipeline_mode<synchronous>, transform_indices = @transform_3, window_bounds = array<i64: 2, 32>}, {pipeline_mode = #tpu.pipeline_mode<synchronous>, transform_indices = @transform_4, window_bounds = array<i64: 2, 1>}, {transform_indices = @transform_5, window_bounds = array<i64: 2, 8>}]} {
    %c0 = arith.constant 0 : index
    %c0_0 = arith.constant 0 : index
    %0 = vector.load %arg1[%c0, %c0_0] : memref<8x400xf32, #tpu.memory_space<vmem>>, vector<8x400xf32>
    %c0_1 = arith.constant 0 : index
    %c0_2 = arith.constant 0 : index
    %1 = vector.load %arg2[%c0_1, %c0_2] : memref<400x32xf32, #tpu.memory_space<vmem>>, vector<400x32xf32>
    %cst = arith.constant dense<0.000000e+00> : vector<8x32xf32>
    %2 = tpu.matmul %0, %1, %cst {dimension_numbers = #tpu.dot_dimension_numbers<[1], [0], [0], [1], [0, 0, 1, 1], [], []>} : vector<8x400xf32>, vector<400x32xf32>, vector<8x32xf32> -> vector<8x32xf32>
    %c0_3 = arith.constant 0 : index
    %c0_4 = arith.constant 0 : index
    %3 = vector.load %arg3[%c0_3, %c0_4] : memref<1x32xf32, #tpu.memory_space<vmem>>, vector<1x32xf32>
    %4 = vector.broadcast %3 : vector<1x32xf32> to vector<8x32xf32>
    %5 = arith.addf %2, %4 : vector<8x32xf32>
    %6 = tpu.iota {dimensions = array<i32: 1>} : vector<8x32xi32>
    %7 = math.sin %5 : vector<8x32xf32>
    %c31_i32 = arith.constant 31 : i32
    %8 = vector.broadcast %c31_i32 : i32 to vector<8x32xi32>
    %9 = arith.cmpi slt, %6, %8 : vector<8x32xi32>
    %10 = arith.select %9, %7, %5 : vector<8x32xi1>, vector<8x32xf32>
    %c0_5 = arith.constant 0 : index
    %c0_6 = arith.constant 0 : index
    %11 = vector.load %arg4[%c0_5, %c0_6] : memref<2x32xf32, #tpu.memory_space<vmem>>, vector<2x32xf32>
    %cst_7 = arith.constant dense<0.000000e+00> : vector<2x8xf32>
    %12 = tpu.matmul %11, %10, %cst_7 {dimension_numbers = #tpu.dot_dimension_numbers<[1], [1], [0], [0], [0, 0, 1, 0], [], []>} : vector<2x32xf32>, vector<8x32xf32>, vector<2x8xf32> -> vector<2x8xf32>
    %c0_8 = arith.constant 0 : index
    %c0_9 = arith.constant 0 : index
    %13 = vector.load %arg5[%c0_8, %c0_9] : memref<2x1xf32, #tpu.memory_space<vmem>>, vector<2x1xf32>
    %14 = vector.broadcast %13 : vector<2x1xf32> to vector<2x8xf32>
    %15 = arith.addf %12, %14 : vector<2x8xf32>
    %c0_10 = arith.constant 0 : index
    %c0_11 = arith.constant 0 : index
    %16 = vector.load %arg6[%c0_10, %c0_11] : memref<2x8xf32, #tpu.memory_space<vmem>>, vector<2x8xf32>
    tpu.vector_store %arg6[%c0_10, %c0_11], %15 {strides = array<i32>} : memref<2x8xf32, #tpu.memory_space<vmem>>, vector<2x8xf32>,
    return
  }
  func.func @transform_0(%arg0: i32) -> (i32, i32) {
    %c0_i32 = arith.constant 0 : i32
    %c0_i32_0 = arith.constant 0 : i32
    return %arg0, %c0_i32 : i32, i32
  }
  func.func @transform_1(%arg0: i32) -> (i32, i32) {
    %c0_i32 = arith.constant 0 : i32
    %c0_i32_0 = arith.constant 0 : i32
    %c0_i32_1 = arith.constant 0 : i32
    return %c0_i32, %c0_i32_0 : i32, i32
  }
  func.func @transform_2(%arg0: i32) -> (i32, i32) {
    %c0_i32 = arith.constant 0 : i32
    %c0_i32_0 = arith.constant 0 : i32
    %c0_i32_1 = arith.constant 0 : i32
    return %c0_i32, %c0_i32_0 : i32, i32
  }
  func.func @transform_3(%arg0: i32) -> (i32, i32) {
    %c0_i32 = arith.constant 0 : i32
    %c0_i32_0 = arith.constant 0 : i32
    %c0_i32_1 = arith.constant 0 : i32
    return %c0_i32, %c0_i32_0 : i32, i32
  }
  func.func @transform_4(%arg0: i32) -> (i32, i32) {
    %c0_i32 = arith.constant 0 : i32
    %c0_i32_0 = arith.constant 0 : i32
    %c0_i32_1 = arith.constant 0 : i32
    return %c0_i32, %c0_i32_0 : i32, i32
  }
  func.func @transform_5(%arg0: i32) -> (i32, i32) {
    %c0_i32 = arith.constant 0 : i32
    %c0_i32_0 = arith.constant 0 : i32
    return %c0_i32, %arg0 : i32, i32
  }
}

</mosaic_0001>

<bundles_post_ra>
// kernel: tpu_custom_call.1
= control target key start
LH: loop header
LB: loop body
LE: loop exit
PB: predicated region body
PF: predicated region fallthrough
CT: control target
= control target key end

     0   :  { %vm79_vm0 = vcmask 130048   ;;  %s690_s0 = inlined_call_operand.vmem [shape: f32[8,400], index: 0, kind: input, shape index: {}]   ;;  %s691_s1 = inlined_call_operand.vmem [shape: f32[400,32], index: 1, kind: input, shape index: {}]   ;;  %s692_s2 = inlined_call_operand.vmem [shape: f32[1,32], index: 2, kind: input, shape index: {}]   ;;  %s693_s3 = inlined_call_operand.vmem [shape: f32[2,32], index: 3, kind: input, shape index: {}]   ;;  %s694_s4 = inlined_call_operand.vmem [shape: f32[2,1], index: 4, kind: input, shape index: {}]   ;;  %s695_s5 = inlined_call_operand.hbm [shape: f32[2,8], index: 5, kind: output, shape index: {}]  }
   0x1   :  { %v72_v0 = vld [vmem:[%s691_s1 + $0x178] sm:$0xff]  ;;  %v71_v2 = vld [vmem:[%s691_s1 + $0x170] sm:$0xff]  ;;  %v70_v5 = vld [vmem:[%s691_s1 + $0x168] sm:$0xff] }
   0x2   :  { %v40_v1 = vld [vmem:[%s691_s1 + $0x78] sm:$0xff]  ;;  %123 = vmatpush.msra.mxu2 %v72_v0  ;;  %v39_v3 = vld [vmem:[%s691_s1 + $0x70] sm:$0xff]  ;;  %v38_v6 = vld [vmem:[%s691_s1 + $0x68] sm:$0xff] }
   0x3   :  { %83 = vmatpush.msra.mxu0 %v40_v1  ;;  %v56_v4 = vld [vmem:[%s691_s1 + $0xf8] sm:$0xff]  ;;  %v55_v7 = vld [vmem:[%s691_s1 + $0xf0] sm:$0xff]  ;;  %v54_v8 = vld [vmem:[%s691_s1 + $0xe8] sm:$0xff] }
   0x4   :  { %103 = vmatpush.msra.mxu1 %v56_v4  ;;  %124 = vmatpush.msra.mxu2 %v71_v2  ;;  %v69_v9 = vld [vmem:[%s691_s1 + $0x160] sm:$0xff]  ;;  %v68_v12 = vld [vmem:[%s691_s1 + $0x158] sm:$0xff]  ;;  %v67_v15 = vld [vmem:[%s691_s1 + $0x150] sm:$0xff] }
   0x5   :  { %84 = vmatpush.msra.mxu0 %v39_v3  ;;  %v37_v10 = vld [vmem:[%s691_s1 + $0x60] sm:$0xff]  ;;  %v36_v13 = vld [vmem:[%s691_s1 + $0x58] sm:$0xff]  ;;  %v35_v16 = vld [vmem:[%s691_s1 + $0x50] sm:$0xff] }
   0x6   :  { %104 = vmatpush.msra.mxu1 %v55_v7  ;;  %125 = vmatpush.msra.mxu2 %v70_v5  ;;  %v53_v11 = vld [vmem:[%s691_s1 + $0xe0] sm:$0xff]  ;;  %v52_v14 = vld [vmem:[%s691_s1 + $0xd8] sm:$0xff]  ;;  %v51_v17 = vld [vmem:[%s691_s1 + $0xd0] sm:$0xff] }
   0x7   :  { %85 = vmatpush.msra.mxu0 %v38_v6  ;;  %v66_v18 = vld [vmem:[%s691_s1 + $0x148] sm:$0xff]  ;;  %v65_v21 = vld [vmem:[%s691_s1 + $0x140] sm:$0xff]  ;;  %v64_v24 = vld [vmem:[%s691_s1 + $0x138] sm:$0xff] }
   0x8   :  { %105 = vmatpush.msra.mxu1 %v54_v8  ;;  %126 = vmatpush.msra.mxu2 %v69_v9  ;;  %v34_v19 = vld [vmem:[%s691_s1 + $0x48] sm:$0xff]  ;;  %v33_v22 = vld [vmem:[%s691_s1 + $0x40] sm:$0xff]  ;;  %v32_v25 = vld [vmem:[%s691_s1 + $0x38] sm:$0xff] }
   0x9   :  { %86 = vmatpush.msra.mxu0 %v37_v10  ;;  %v50_v20 = vld [vmem:[%s691_s1 + $0xc8] sm:$0xff]  ;;  %v49_v23 = vld [vmem:[%s691_s1 + $0xc0] sm:$0xff]  ;;  %v48_v26 = vld [vmem:[%s691_s1 + $0xb8] sm:$0xff] }
   0xa   :  { %106 = vmatpush.msra.mxu1 %v53_v11  ;;  %127 = vmatpush.msra.mxu2 %v68_v12  ;;  %v74_v27 = vld [vmem:[%s691_s1 + $0x188] sm:$0xff]  ;;  %v63_v28 = vld [vmem:[%s691_s1 + $0x130] sm:$0xff]  ;;  %v73_v30 = vld [vmem:[%s691_s1 + $0x180] sm:$0xff] }
   0xb   :  { %87 = vmatpush.msra.mxu0 %v36_v13  ;;  %v31_v29 = vld [vmem:[%s691_s1 + $0x30] sm:$0xff]  ;;  %157 = vmatpush.msra.mxu3 %v74_v27  ;;  %v62_v31 = vld [vmem:[%s691_s1 + $0x128] sm:$0xff]  ;;  %v24_v33 = vld [vmem:[%s690_s0 + $0x18] sm:$0xff] }
   0xc   :  { %107 = vmatpush.msra.mxu1 %v52_v14  ;;  %128 = vmatpush.msra.mxu2 %v67_v15  ;;  %v47_v32 = vld [vmem:[%s691_s1 + $0xb0] sm:$0xff]  ;;  %v30_v34 = vld [vmem:[%s691_s1 + $0x28] sm:$0xff] }
   0xd   :  { %88 = vmatpush.msra.mxu0 %v35_v16  ;;  %158 = vmatpush.msra.mxu3 %v73_v30 }
   0xe   :  { %108 = vmatpush.msra.mxu1 %v51_v17  ;;  %129 = vmatpush.msra.mxu2 %v66_v18 }
   0xf   :  { %89 = vmatpush.msra.mxu0 %v34_v19 }
  0x10   :  { %109 = vmatpush.msra.mxu1 %v50_v20  ;;  %130 = vmatpush.msra.mxu2 %v65_v21 }
  0x11   :  { %90 = vmatpush.msra.mxu0 %v33_v22 }
  0x12   :  { %110 = vmatpush.msra.mxu1 %v49_v23  ;;  %131 = vmatpush.msra.mxu2 %v64_v24 }
  0x13   :  { %91 = vmatpush.msra.mxu0 %v32_v25 }
  0x14   :  { %111 = vmatpush.msra.mxu1 %v48_v26 }
  0x15   :  { %10 = vsyncpa [#allocation3], 0  ;;  %132 = vmatpush.msra.mxu2 %v63_v28  ;;  %92 = vmatpush.msra.mxu0 %v31_v29  ;;  %v46_v35 = vld [vmem:[%s691_s1 + $0xa8] sm:$0xff]  ;;  %v61_v36 = vld [vmem:[%s691_s1 + $0x120] sm:$0xff]  ;;  %v416_v62 = vmov 0   ;;  %s423_s28 = smov [#allocation2]  }
  0x16   :  { %112 = vmatpush.msra.mxu1 %v47_v32  ;;  %v29_v37 = vld [vmem:[%s691_s1 + $0x20] sm:$0xff]  ;;  %374 = vmatmul.msk.f32.vlgmr.msra.gmra.mxu3 %vm79_vm0, %v24_v33  ;;  %v60_v39 = vld [vmem:[%s691_s1 + $0x118] sm:$0xff]  ;;  %v59_v42 = vld [vmem:[%s691_s1 + $0x110] sm:$0xff]  ;;  %v417_v11 = vmov 683565275   ;;  %s363_s29 = sshll.u32 %s423_s28, 4  ;;  %s364_s29 = int_to_ptr.vmem [resolvable:$true] %s363_s29 }
  0x17   :  { %133 = vmatpush.msra.mxu2 %v62_v31  ;;  %93 = vmatpush.msra.mxu0 %v30_v34  ;;  %v45_v38 = vld [vmem:[%s691_s1 + $0xa0] sm:$0xff]  ;;  %v28_v40 = vld [vmem:[%s691_s1 + $0x18] sm:$0xff]  ;;  %v27_v43 = vld [vmem:[%s691_s1 + $0x10] sm:$0xff]  ;;  %v418_v13 = vmov 2475754826   ;;  %s365_s7 = sshll.u32 %s695_s5, 4  ;;  %s366_s7 = int_to_ptr.hbm [resolvable:$true] %s365_s7 }
  0x18   :  { %113 = vmatpush.msra.mxu1 %v46_v35  ;;  %v44_v41 = vld [vmem:[%s691_s1 + $0x98] sm:$0xff]  ;;  %v43_v44 = vld [vmem:[%s691_s1 + $0x90] sm:$0xff]  ;;  %v58_v45 = vld [vmem:[%s691_s1 + $0x108] sm:$0xff]  ;;  %388 = vset.pattern.permute.xlu0 %v416_v62  ;;  %v419_v16 = vmov 2131351028  }
  0x19   :  { %134 = vmatpush.msra.mxu2 %v61_v36  ;;  %94 = vmatpush.msra.mxu0 %v29_v37  ;;  %v26_v46 = vld [vmem:[%s691_s1 + $0x8] sm:$0xff]  ;;  %v57_v48 = vld [vmem:[%s691_s1 + $0x100] sm:$0xff]  ;;  %v23_v50 = vld [vmem:[%s690_s0 + $0x10] sm:$0xff]  ;;  %v420_v19 = vmov 2102212464  }
  0x1a   :  { %114 = vmatpush.msra.mxu1 %v45_v38  ;;  %v42_v47 = vld [vmem:[%s691_s1 + $0x88] sm:$0xff]  ;;  %v25_v49 = vld [vmem:[%s691_s1] sm:$0xff]  ;;  %v421_v22 = vmov 920167782   ;;  %v422_v25 = vmov 1326507024  }
  0x1b   :  { %135 = vmatpush.msra.mxu2 %v60_v39  ;;  %95 = vmatpush.msra.mxu0 %v28_v40  ;;  %v21_v51 = vld [vmem:[%s690_s0] sm:$0xff]  ;;  %v22_v53 = vld [vmem:[%s690_s0 + $0x8] sm:$0xff] }
  0x1c   :  { %115 = vmatpush.msra.mxu1 %v44_v41  ;;  %v41_v52 = vld [vmem:[%s691_s1 + $0x80] sm:$0xff] }
  0x1d   :  { %136 = vmatpush.msra.mxu2 %v59_v42  ;;  %96 = vmatpush.msra.mxu0 %v27_v43  ;;  %v389_v54 = vld [vmem:[%s692_s2] ss:$0 sm:$0xff] }
  0x1e   :  { %116 = vmatpush.msra.mxu1 %v43_v44 }
  0x1f   :  { %137 = vmatpush.msra.mxu2 %v58_v45  ;;  %97 = vmatpush.msra.mxu0 %v26_v46 }
  0x20   :  { %117 = vmatpush.msra.mxu1 %v42_v47 }
  0x21   :  { %138 = vmatpush.msra.mxu2 %v57_v48  ;;  %98 = vmatpush.msra.mxu0 %v25_v49 }
  0x22   :  { %139 = vmatmul.f32.vlgmr.msra.gmra.mxu2 %v23_v50  ;;  %99 = vmatmul.f32.vlgmr.msra.gmra.mxu0 %v21_v51 }
  0x23   :  { %118 = vmatpush.msra.mxu1 %v41_v52 }
  0x24   :  { %119 = vmatmul.f32.vlgmr.msra.gmra.mxu1 %v22_v53 }
  0x99   :  { %v160_v60 = vpop.f32.mrf.mxu3 }
  0x9f   :  { %v100_v55 = vpop.f32.mrf.mxu0 }
  0xa0   :  { %v101_v56 = vadd.f32 %v389_v54, %v100_v55 }
  0xa1   :  { %v120_v57 = vpop.f32.mrf.mxu1 }
  0xa2   :  { %v121_v58 = vadd.f32 %v120_v57, %v101_v56 }
  0xa5   :  { %v140_v59 = vpop.f32.mrf.mxu2 }
  0xa6   :  { %v141_v61 = vadd.f32 %v140_v59, %v121_v58 }
  0xa8   :  { %v620_v63 = vadd.f32 %v160_v60, %v141_v61 }
  0xaa   :  { %v168_v0 = vand.u32 2139095040, %v620_v63  ;;  %v165_v3 = vand.u32 2147483647, %v620_v63  ;;  %vm167_vm13 = vcmp.lt.s32.totalorder %v620_v63, 0 }
  0xac   :  { %v169_v1 = vshrl.u32 %v168_v0, 23  ;;  %v172_v6 = vand.u32 8388607, %v165_v3  ;;  %vm166_vm14 = vcmp.le.f32.partialorder %v165_v3, 0.7853982 }
  0xae   :  { %v375_v2 = vadd.s32 4294967169, %v169_v1  ;;  %v173_v10 = vor.u32 8388608, %v172_v6 }
  0xb0   :  { %v175_v4 = vadd.s32 1, %v375_v2  ;;  %v637_v32 = vshll.u32 %v173_v10, 8 }
  0xb2   :  { %vm176_vm1 = vcmp.gt.s32.totalorder %v175_v4, 0  ;;  %v214_v41 = vand.u32 65535, %v637_v32  ;;  %v215_v42 = vshrl.u32 %v637_v32, 16 }
  0xb3   :  { %v177_v5 = vsel %vm176_vm1, %v175_v4, 0 }
  0xb4   :  { %v179_v7 = vand.u32 31, %v177_v5  ;;  %v628_v9 = vshrl.u32 %v177_v5, 5 }
  0xb6   :  { %v626_v8 = vsub.s32 32, %v179_v7  ;;  %v182_v12 = vshll.u32 %v417_v11, %v179_v7  ;;  %v185_v14 = vshll.u32 %v418_v13, %v179_v7  ;;  %v188_v18 = vshll.u32 %v419_v16, %v179_v7 }
  0xb7   :  { %v191_v21 = vshll.u32 %v420_v19, %v179_v7  ;;  %v194_v24 = vshll.u32 %v421_v22, %v179_v7  ;;  %vm197_vm2 = vcmp.lt.s32.totalorder %v628_v9, 1  ;;  %vm200_vm3 = vcmp.lt.s32.totalorder %v628_v9, 4 }
  0xb8   :  { %v183_v15 = vshrl.u32 %v418_v13, %v626_v8  ;;  %v186_v17 = vshrl.u32 %v419_v16, %v626_v8  ;;  %v189_v20 = vshrl.u32 %v420_v19, %v626_v8  ;;  %v192_v23 = vshrl.u32 %v421_v22, %v626_v8 }
  0xb9   :  { %v195_v26 = vshrl.u32 %v422_v25, %v626_v8  ;;  %vm199_vm4 = vcmp.lt.s32.totalorder %v628_v9, 3  ;;  %vm198_vm5 = vcmp.lt.s32.totalorder %v628_v9, 2  ;;  %v181_v6 = vshrl.u32 %v417_v11, %v626_v8 }
  0xba   :  { %v184_v27 = vor.u32 %v183_v15, %v182_v12  ;;  %v187_v28 = vor.u32 %v186_v17, %v185_v14  ;;  %v190_v29 = vor.u32 %v189_v20, %v188_v18  ;;  %v193_v30 = vor.u32 %v192_v23, %v191_v21 }
  0xbb   :  { %v196_v31 = vor.u32 %v195_v26, %v194_v24 }
  0xbc   :  { %v205_v33 = vsel %vm197_vm2, %v184_v27, %v187_v28  ;;  %v209_v34 = vsel %vm197_vm2, %v187_v28, %v190_v29  ;;  %v206_v35 = vsel %vm200_vm3, %v193_v30, 920167782  ;;  %v202_v2 = vsel %vm200_vm3, %v190_v29, 2102212464 }
  0xbd   :  { %v210_v36 = vsel %vm200_vm3, %v196_v31, 1326507024  ;;  %v207_v37 = vsel %vm199_vm4, %v190_v29, %v206_v35  ;;  %v201_v15 = vsel %vm197_vm2, %v181_v6, %v184_v27  ;;  %v203_v16 = vsel %vm199_vm4, %v187_v28, %v202_v2 }
  0xbe   :  { %v211_v38 = vsel %vm199_vm4, %v193_v30, %v210_v36  ;;  %v208_v39 = vsel %vm198_vm5, %v205_v33, %v207_v37  ;;  %v204_v8 = vsel %vm198_vm5, %v201_v15, %v203_v16  ;;  %vm308_vm3 = vweird.f32 %v620_v63 }
  0xbf   :  { %v212_v40 = vsel %vm198_vm5, %v209_v34, %v211_v38  ;;  %v238_v45 = vand.u32 65535, %v208_v39  ;;  %v239_v46 = vshrl.u32 %v208_v39, 16  ;;  %v258_v23 = vmul.u32 %v637_v32, %v204_v8 }
  0xc0   :  { %v216_v43 = vand.u32 65535, %v212_v40  ;;  %v217_v44 = vshrl.u32 %v212_v40, 16  ;;  %vm329_vm4 = vcmask 261120   ;;  %vm356_vm5 = vcmask 58368  }
  0xc1   :  { %v241_v49 = vmul.u32 %v239_v46, %v214_v41  ;;  %v242_v50 = vmul.u32 %v238_v45, %v215_v42  ;;  %v240_v54 = vmul.u32 %v238_v45, %v214_v41  ;;  %v243_v58 = vmul.u32 %v239_v46, %v215_v42  ;;  %v323_v45 = vld [vmem:[%s694_s4] sm:$0x3] }
  0xc2   :  { %v219_v47 = vmul.u32 %v217_v44, %v214_v41  ;;  %v220_v48 = vmul.u32 %v216_v43, %v215_v42  ;;  %v218_v51 = vmul.u32 %v216_v43, %v214_v41  ;;  %v221_v53 = vmul.u32 %v217_v44, %v215_v42  ;;  %326 = vperm.xlu0 %388, %v323_v45  }
  0xc3   :  { %v244_v55 = vshll.u32 %v241_v49, 16  ;;  %v246_v60 = vshll.u32 %v242_v50, 16  ;;  %v245_v13 = vshrl.u32 %v241_v49, 16  ;;  %v247_v19 = vshrl.u32 %v242_v50, 16 }
  0xc4   :  { %v222_v52 = vshll.u32 %v219_v47, 16  ;;  %v224_v56 = vshll.u32 %v220_v48, 16  ;;  %v223_v7 = vshrl.u32 %v219_v47, 16  ;;  %v225_v17 = vshrl.u32 %v220_v48, 16 }
  0xc5   :  { %vm248_vm7 = vc.u32 %v240_v54, %v244_v55  ;;  %v250_v61 = vadd.s32 %v244_v55, %v240_v54 }
  0xc6   :  { %vm226_vm6 = vc.u32 %v218_v51, %v222_v52  ;;  %v228_v57 = vadd.s32 %v222_v52, %v218_v51  ;;  %v249_v1 = vsel %vm248_vm7, 1, %v416_v62 }
  0xc7   :  { %v227_v59 = vsel %vm226_vm6, 1, %v416_v62  ;;  %v251_v5 = vadd.s32 %v249_v1, %v243_v58  ;;  %vm252_vm9 = vc.u32 %v250_v61, %v246_v60  ;;  %v254_v22 = vadd.s32 %v250_v61, %v246_v60 }
  0xc8   :  { %v229_v0 = vadd.s32 %v227_v59, %v221_v53  ;;  %vm230_vm8 = vc.u32 %v228_v57, %v224_v56  ;;  %v253_v12 = vsel %vm252_vm9, 1, %v416_v62  ;;  %v163_v1 = vlaneseq }
  0xc9   :  { %v231_v4 = vsel %vm230_vm8, 1, %v416_v62  ;;  %v255_v14 = vadd.s32 %v253_v12, %v251_v5 }
  0xca   :  { %v233_v10 = vadd.s32 %v231_v4, %v229_v0 }
  0xcb   :  { %v256_v20 = vadd.s32 %v255_v14, %v245_v13 }
  0xcc   :  { %v234_v18 = vadd.s32 %v233_v10, %v223_v7  ;;  %v164_v7 = vand.u32 127, %v163_v1 }
  0xcd   :  { %v257_v11 = vadd.s32 %v256_v20, %v247_v19  ;;  %v322_v19 = vld [vmem:[%s693_s3] sm:$0x3] }
  0xce   :  { %v235_v21 = vadd.s32 %v234_v18, %v225_v17  ;;  %vm320_vm2 = vcmp.lt.s32.totalorder %v164_v7, 31 }
  0xcf   :  { %v261_v62 = vadd.s32 1, %v257_v11 }
  0xd0   :  { %vm260_vm10 = vc.u32 %v235_v21, %v254_v22  ;;  %v259_v9 = vadd.s32 %v254_v22, %v235_v21 }
  0xd1   :  { %v262_v24 = vsel %vm260_vm10, %v261_v62, %v257_v11 }
  0xd2   :  { %v263_v25 = vadd.s32 %v262_v24, %v258_v23 }
  0xd4   :  { %v264_v26 = vadd.s32 536870912, %v263_v25 }
  0xd6   :  { %v265_v27 = vshrl.u32 %v264_v26, 30 }
  0xd8   :  { %v266_v29 = vshll.u32 %v265_v27, 30  ;;  %v289_v49 = vsub.s32 4, %v265_v27 }
  0xda   :  { %v267_v28 = vsub.s32 %v263_v25, %v266_v29  ;;  %v290_v54 = vsel %vm167_vm13, %v289_v49, %v265_v27 }
  0xdb   :  { %v292_v57 = vsel %vm166_vm14, 0, %v290_v54 }
  0xdc   :  { %vm268_vm11 = vcmp.lt.s32.totalorder %v267_v28, 0  ;;  %v269_v30 = vsub.s32 0, %v267_v28  ;;  %v309_v0 = vadd.s32 3, %v292_v57 }
  0xde   :  { %v270_v31 = vsel %vm268_vm11, %v269_v30, %v267_v28  ;;  %v310_v6 = vand.u32 3, %v309_v0 }
  0xdf   :  { %v271_v33 = vclz %v270_v31 }
  0xe0   :  { %vm312_vm15 = vcmp.eq.s32.totalorder %v310_v6, 0  ;;  %vm315_vm0 = vcmp.eq.s32.totalorder %v310_v6, 2  ;;  %vm311_vm1 = vcmp.lt.s32.totalorder %v310_v6, 2 }
  0xe1   :  { %v376_v34 = vadd.s32 4294967294, %v271_v33 }
  0xe3   :  { %vm377_vm12 = vcmp.lt.s32.totalorder %v376_v34, 0 }
  0xe4   :  { %v274_v35 = vsel %vm377_vm12, 0, %v376_v34 }
  0xe5   :  { %v275_v36 = vsub.s32 32, %v274_v35  ;;  %v279_v37 = vsub.s32 4294967266, %v274_v35  ;;  %v276_v38 = vshll.u32 %v267_v28, %v274_v35 }
  0xe7   :  { %v277_v39 = vshrl.u32 %v259_v9, %v275_v36  ;;  %v280_v40 = vadd.s32 127, %v279_v37 }
  0xe9   :  { %v278_v32 = vor.u32 %v277_v39, %v276_v38  ;;  %v281_v41 = vshll.u32 %v280_v40, 23 }
  0xeb   :  { %v282_v42 = vor.u32 4788187, %v281_v41  ;;  %v285_v44 = vcvt.s32.f32 %v278_v32 }
  0xed   :  { %v283_v43 = vand.u32 2147483647, %v282_v42 }
  0xef   :  { %v286_v46 = vmul.f32 %v285_v44, %v283_v43 }
  0xf1   :  { %v287_v47 = vxor.u32 2147483648, %v286_v46 }
  0xf3   :  { %v288_v48 = vsel %vm167_vm13, %v287_v47, %v286_v46 }
  0xf4   :  { %v291_v50 = vsel %vm166_vm14, %v620_v63, %v288_v48 }
  0xf5   :  { %v293_v51 = vmul.f32 %v291_v50, %v291_v50 }
  0xf7   :  { %v294_v52 = vmul.f32 -0.001358992, %v293_v51  ;;  %v301_v53 = vmul.f32 -0.00019511016, %v293_v51 }
  0xf9   :  { %v295_v55 = vadd.f32 0.041655596, %v294_v52  ;;  %v302_v56 = vadd.f32 0.008332121, %v301_v53 }
  0xfb   :  { %v296_v58 = vmul.f32 %v295_v55, %v293_v51  ;;  %v303_v59 = vmul.f32 %v302_v56, %v293_v51 }
  0xfd   :  { %v297_v60 = vadd.f32 -0.4999988, %v296_v58  ;;  %v304_v61 = vadd.f32 -0.16666654, %v303_v59 }
  0xff   :  { %v298_v2 = vmul.f32 %v297_v60, %v293_v51  ;;  %v305_v4 = vmul.f32 %v304_v61, %v293_v51 }
 0x101   :  { %v299_v3 = vadd.f32 1.0, %v298_v2  ;;  %v306_v5 = vadd.f32 1.0, %v305_v4 }
 0x103   :  { %v307_v10 = vmul.f32 %v306_v5, %v291_v50  ;;  %v316_v12 = vxor.u32 2147483648, %v299_v3 }
 0x105   :  { %v313_v13 = vxor.u32 2147483648, %v307_v10  ;;  %v317_v15 = vsel %vm315_vm0, %v316_v12, %v307_v10 }
 0x107   :  { %v314_v14 = vsel %vm312_vm15, %v299_v3, %v313_v13 }
 0x108   :  { %v318_v16 = vsel %vm311_vm1, %v314_v14, %v317_v15 }
 0x109   :  { %v319_v17 = vsel %vm308_vm3, nan, %v318_v16 }
 0x10a   :  { %v321_v18 = vsel %vm320_vm2, %v319_v17, %v620_v63 }
 0x10b   :  { %378 = vmatpush.xpose.msk.msrb.mxu3 %vm329_vm4, %v321_v18 }
 0x10e   :  { %379 = vmatmul.msk.f32.vlgmr.msrb.gmra.mxu3 %vm329_vm4, %v322_v19 }
 0x134   :  { %v327_v20 = vpop.permute.xlu0 %326 }
 0x191   :  { %v353_v21 = vpop.f32.mrf.mxu3 }
 0x192   :  { %v354_v22 = vadd.f32 %v353_v21, %v327_v20 }
 0x194   :  { %357 = vst.msk [vmem:[#allocation2] sm:$0x3] %vm356_vm5, %v354_v22 }
 0x195   :  { %368 = dma.vmem_to_hbm [thread:$0]  %s364_s29, 32, %s366_s7, [#allocation3]  }
 0x196   :  { %414 = dma.done.wait [#allocation3], 32  }
 0x197   :  { %415 = vsyncadd [#allocation3], 4294967264 }
 0x198   :  { %373 = vsyncpa [#allocation3], 1 }

</bundles_post_ra>
